<compile_context>
chip_gen: v7x
topology: tpu7x:2x2x1
jax: 0.10.0
libtpu: 0.0.40
codegen_flags: <defaults>
</compile_context>

<pallas_src>
import functools

import jax
import jax.numpy as jnp
from jax.experimental import pallas as pl
from jax.experimental.pallas import tpu as pltpu


def _round_up(x, m):
    return (x + m - 1) // m * m


def _deformation_loss_kernel(d_i_ref, d_all_ref, out_ref, *, batch, joints):
    # d_i_ref:   f32[3, TBi,  J_pad]  -- this block's rows of d = pred - recon
    # d_all_ref: f32[3, B_pad, J_pad] -- all rows of d
    # out_ref:   f32[1, 1,   J_pad]   -- lane-dense partial sum for this block
    pid = pl.program_id(0)
    tbi, j_pad = d_i_ref.shape[1], d_i_ref.shape[2]
    b_pad = d_all_ref.shape[1]

    lim = jnp.float32(1e6)
    eps = jnp.float32(1e-6)

    def coord_sq(c):
        a = d_i_ref[c]                        # (TBi, J_pad)
        b = d_all_ref[c]                      # (B_pad, J_pad)
        dd = a[:, None, :] - b[None, :, :]    # (TBi, B_pad, J_pad), one VPU pass
        dd = jnp.clip(dd, -lim, lim)          # vmin + vmax
        return dd * dd

    # Squared L2 over the 3 coordinates = plain VPU multiply/adds (no XLU).
    sq = coord_sq(0) + coord_sq(1) + coord_sq(2)        # (TBi, B_pad, J_pad)
    dist = jnp.sqrt(sq + eps)                            # EUP, free slot

    # Select i < j pairs with real batch rows; padded batch rows are masked too.
    ii = jax.lax.broadcasted_iota(jnp.int32, (tbi, b_pad), 0) + pid * tbi
    jj = jax.lax.broadcasted_iota(jnp.int32, (tbi, b_pad), 1)
    pair_mask = jnp.logical_and(ii < jj, jj < batch).astype(jnp.float32)  # (TBi, B_pad)

    # Staged reduction: sum the (i, j) axes -> lane-wide partial (VPU/XLU-light),
    # final cross-lane sum happens in the wrapper.
    partial = jnp.sum(dist * pair_mask[:, :, None], axis=(0, 1),
                      keepdims=True)                     # (1, 1, J_pad)

    # Zero padded joint lanes (they would otherwise contribute sqrt(eps) each).
    lane_mask = (jax.lax.broadcasted_iota(jnp.int32, (1, 1, j_pad), 2)
                 < joints).astype(jnp.float32)
    out_ref[...] = partial * lane_mask


def deformation_loss(pred_3d, reconstructed_3d):
    """pred_3d, reconstructed_3d: [B, J, 3] (PyTorch convention). Returns scalar f32."""
    B, J, C = pred_3d.shape
    assert C == 3
    if B <= 1:
        return jnp.float32(0.0)
    num_pairs = B * (B - 1) // 2

    p = pred_3d.astype(jnp.float32)
    r = reconstructed_3d.astype(jnp.float32)

    # Per-sample deformation computed once; re-laid out lane-dense: [3, B, J].
    d = jnp.transpose(p - r, (2, 0, 1))                  # (3, B, J)

    j_pad = _round_up(J, 128)
    b8 = _round_up(B, 8)

    # i-row block size: multiple of 8, sized so the (TBi, B_pad, J_pad) slab
    # stays ~2 MiB (fits v7x's smaller VMEM with headroom for intermediates).
    row_bytes = b8 * j_pad * 4
    budget = 2 * 1024 * 1024
    max_rows = max(8, (budget // row_bytes) // 8 * 8)
    tbi = min(b8, max_rows)
    b_pad = _round_up(B, tbi)
    num_blocks = b_pad // tbi

    d = jnp.pad(d, ((0, 0), (0, b_pad - B), (0, j_pad - J)))  # zeros; masked in-kernel

    kernel = functools.partial(_deformation_loss_kernel, batch=B, joints=J)

    # Conservative scoped-VMEM request: double-buffered inputs + intermediates.
    est = (2 * (3 * tbi * j_pad + 3 * b_pad * j_pad)
           + 8 * tbi * b_pad * j_pad
           + 2 * j_pad) * 4
    vmem_limit = int(min(48 * 1024 * 1024, max(16 * 1024 * 1024, 2 * est)))

    partials = pl.pallas_call(
        kernel,
        out_shape=jax.ShapeDtypeStruct((num_blocks, 1, j_pad), jnp.float32),
        grid=(num_blocks,),
        in_specs=[
            pl.BlockSpec((3, tbi, j_pad), lambda i: (0, i, 0)),     # this block's rows
            pl.BlockSpec((3, b_pad, j_pad), lambda i: (0, 0, 0)),   # all rows
        ],
        out_specs=pl.BlockSpec((1, 1, j_pad), lambda i: (i, 0, 0)),  # lane-dense partial
        compiler_params=pltpu.CompilerParams(
            dimension_semantics=("parallel",),
            vmem_limit_bytes=vmem_limit,
        ),
    )(d, d)

    # Tiny finishing reduction + normalization (1 / (J * num_pairs)).
    return jnp.sum(partials) / jnp.float32(J * num_pairs)


def _reference_loss(pred_3d, reconstructed_3d):
    """Pure-JAX reference mirroring the PyTorch module exactly."""
    B = pred_3d.shape[0]
    if B <= 1:
        return jnp.float32(0.0)
    loss = jnp.float32(0.0)
    eps = 1e-6
    for i in range(B):
        for j in range(i + 1, B):
            orig_diff = pred_3d[i] - pred_3d[j]
            recon_diff = reconstructed_3d[i] - reconstructed_3d[j]
            diff = jnp.clip(orig_diff - recon_diff, -1e6, 1e6)
            deform_diff = jnp.sqrt(jnp.sum(diff * diff, axis=-1) + eps)
            loss = loss + jnp.mean(deform_diff)
    num_pairs = B * (B - 1) // 2
    return loss / num_pairs


if __name__ == "__main__":
    key = jax.random.PRNGKey(0)
    k1, k2 = jax.random.split(key)

    B, J = 4, 16  # batch of 4 poses, 16 joints, 3 coords each
    pred_3d = jax.random.normal(k1, (B, J, 3), dtype=jnp.float32)
    reconstructed_3d = pred_3d + 0.1 * jax.random.normal(k2, (B, J, 3), dtype=jnp.float32)

    loss = deformation_loss(pred_3d, reconstructed_3d)
    loss = jax.block_until_ready(loss)

    ref = jax.block_until_ready(_reference_loss(pred_3d, reconstructed_3d))
    assert jnp.allclose(loss, ref, rtol=1e-5, atol=1e-6), (loss, ref)

    print("KERNEL_OK")
</pallas_src>

<mosaic_0001>
module attributes {stable_mosaic.version = 11 : i64} {
  func.func @_deformation_loss_kernel(%arg0: i32, %arg1: memref<3x8x128xf32, #tpu.memory_space<vmem>>, %arg2: memref<3x8x128xf32, #tpu.memory_space<vmem>>, %arg3: memref<1x1x128xf32, #tpu.memory_space<vmem>>) attributes {dimension_semantics = [#tpu.dimension_semantics<parallel>], iteration_bounds = array<i64: 1>, scalar_prefetch = 0 : i64, scratch_operands = 0 : i64, tpu.core_type = #tpu.core_type<tc>, window_params = [{transform_indices = @transform_0, window_bounds = array<i64: 3, 8, 128>}, {pipeline_mode = #tpu.pipeline_mode<synchronous>, transform_indices = @transform_1, window_bounds = array<i64: 3, 8, 128>}, {transform_indices = @transform_2, window_bounds = array<i64: 1, 1, 128>}]} {
    %c0 = arith.constant 0 : index
    %c0_0 = arith.constant 0 : index
    %c0_1 = arith.constant 0 : index
    %0 = vector.load %arg1[%c0, %c0_0, %c0_1] : memref<3x8x128xf32, #tpu.memory_space<vmem>>, vector<1x8x128xf32>
    %1 = vector.shape_cast %0 : vector<1x8x128xf32> to vector<8x128xf32>
    %c0_2 = arith.constant 0 : index
    %c0_3 = arith.constant 0 : index
    %c0_4 = arith.constant 0 : index
    %2 = vector.load %arg2[%c0_2, %c0_3, %c0_4] : memref<3x8x128xf32, #tpu.memory_space<vmem>>, vector<1x8x128xf32>
    %3 = vector.shape_cast %2 : vector<1x8x128xf32> to vector<8x128xf32>
    %4 = vector.shape_cast %1 : vector<8x128xf32> to vector<8x1x128xf32>
    %5 = vector.shape_cast %3 : vector<8x128xf32> to vector<1x8x128xf32>
    %6 = vector.broadcast %4 : vector<8x1x128xf32> to vector<8x8x128xf32>
    %7 = vector.broadcast %5 : vector<1x8x128xf32> to vector<8x8x128xf32>
    %8 = arith.subf %6, %7 : vector<8x8x128xf32>
    %cst = arith.constant 0.000000e+00 : f32
    %cst_5 = arith.constant 1.000000e+06 : f32
    %9 = arith.subf %cst, %cst_5 : f32
    %cst_6 = arith.constant 1.000000e+06 : f32
    %10 = vector.broadcast %9 : f32 to vector<8x8x128xf32>
    %11 = arith.maximumf %10, %8 : vector<8x8x128xf32>
    %12 = vector.broadcast %cst_6 : f32 to vector<8x8x128xf32>
    %13 = arith.minimumf %12, %11 : vector<8x8x128xf32>
    %14 = arith.mulf %13, %13 : vector<8x8x128xf32>
    %c1 = arith.constant 1 : index
    %c0_7 = arith.constant 0 : index
    %c0_8 = arith.constant 0 : index
    %15 = vector.load %arg1[%c1, %c0_7, %c0_8] : memref<3x8x128xf32, #tpu.memory_space<vmem>>, vector<1x8x128xf32>
    %16 = vector.shape_cast %15 : vector<1x8x128xf32> to vector<8x128xf32>
    %c1_9 = arith.constant 1 : index
    %c0_10 = arith.constant 0 : index
    %c0_11 = arith.constant 0 : index
    %17 = vector.load %arg2[%c1_9, %c0_10, %c0_11] : memref<3x8x128xf32, #tpu.memory_space<vmem>>, vector<1x8x128xf32>
    %18 = vector.shape_cast %17 : vector<1x8x128xf32> to vector<8x128xf32>
    %19 = vector.shape_cast %16 : vector<8x128xf32> to vector<8x1x128xf32>
    %20 = vector.shape_cast %18 : vector<8x128xf32> to vector<1x8x128xf32>
    %21 = vector.broadcast %19 : vector<8x1x128xf32> to vector<8x8x128xf32>
    %22 = vector.broadcast %20 : vector<1x8x128xf32> to vector<8x8x128xf32>
    %23 = arith.subf %21, %22 : vector<8x8x128xf32>
    %cst_12 = arith.constant 0.000000e+00 : f32
    %cst_13 = arith.constant 1.000000e+06 : f32
    %24 = arith.subf %cst_12, %cst_13 : f32
    %cst_14 = arith.constant 1.000000e+06 : f32
    %25 = vector.broadcast %24 : f32 to vector<8x8x128xf32>
    %26 = arith.maximumf %25, %23 : vector<8x8x128xf32>
    %27 = vector.broadcast %cst_14 : f32 to vector<8x8x128xf32>
    %28 = arith.minimumf %27, %26 : vector<8x8x128xf32>
    %29 = arith.mulf %28, %28 : vector<8x8x128xf32>
    %30 = arith.addf %14, %29 : vector<8x8x128xf32>
    %c2 = arith.constant 2 : index
    %c0_15 = arith.constant 0 : index
    %c0_16 = arith.constant 0 : index
    %31 = vector.load %arg1[%c2, %c0_15, %c0_16] : memref<3x8x128xf32, #tpu.memory_space<vmem>>, vector<1x8x128xf32>
    %32 = vector.shape_cast %31 : vector<1x8x128xf32> to vector<8x128xf32>
    %c2_17 = arith.constant 2 : index
    %c0_18 = arith.constant 0 : index
    %c0_19 = arith.constant 0 : index
    %33 = vector.load %arg2[%c2_17, %c0_18, %c0_19] : memref<3x8x128xf32, #tpu.memory_space<vmem>>, vector<1x8x128xf32>
    %34 = vector.shape_cast %33 : vector<1x8x128xf32> to vector<8x128xf32>
    %35 = vector.shape_cast %32 : vector<8x128xf32> to vector<8x1x128xf32>
    %36 = vector.shape_cast %34 : vector<8x128xf32> to vector<1x8x128xf32>
    %37 = vector.broadcast %35 : vector<8x1x128xf32> to vector<8x8x128xf32>
    %38 = vector.broadcast %36 : vector<1x8x128xf32> to vector<8x8x128xf32>
    %39 = arith.subf %37, %38 : vector<8x8x128xf32>
    %cst_20 = arith.constant 0.000000e+00 : f32
    %cst_21 = arith.constant 1.000000e+06 : f32
    %40 = arith.subf %cst_20, %cst_21 : f32
    %cst_22 = arith.constant 1.000000e+06 : f32
    %41 = vector.broadcast %40 : f32 to vector<8x8x128xf32>
    %42 = arith.maximumf %41, %39 : vector<8x8x128xf32>
    %43 = vector.broadcast %cst_22 : f32 to vector<8x8x128xf32>
    %44 = arith.minimumf %43, %42 : vector<8x8x128xf32>
    %45 = arith.mulf %44, %44 : vector<8x8x128xf32>
    %46 = arith.addf %30, %45 : vector<8x8x128xf32>
    %cst_23 = arith.constant 9.99999997E-7 : f32
    %47 = vector.broadcast %cst_23 : f32 to vector<8x8x128xf32>
    %48 = arith.addf %46, %47 : vector<8x8x128xf32>
    %49 = math.sqrt %48 : vector<8x8x128xf32>
    %50 = tpu.iota {dimensions = array<i32: 0>} : vector<8x8xi32>
    %c8_i32 = arith.constant 8 : i32
    %51 = arith.muli %arg0, %c8_i32 : i32
    %52 = vector.broadcast %51 : i32 to vector<8x8xi32>
    %53 = arith.addi %50, %52 : vector<8x8xi32>
    %54 = tpu.iota {dimensions = array<i32: 1>} : vector<8x8xi32>
    %55 = arith.cmpi slt, %53, %54 : vector<8x8xi32>
    %c4_i32 = arith.constant 4 : i32
    %56 = vector.broadcast %c4_i32 : i32 to vector<8x8xi32>
    %57 = arith.cmpi slt, %54, %56 : vector<8x8xi32>
    %58 = arith.andi %55, %57 : vector<8x8xi1>
    %59 = arith.extui %58 : vector<8x8xi1> to vector<8x8xi32>
    %60 = arith.sitofp %59 : vector<8x8xi32> to vector<8x8xf32>
    %61 = vector.shape_cast %60 : vector<8x8xf32> to vector<8x8x1xf32>
    %62 = vector.broadcast %61 : vector<8x8x1xf32> to vector<8x8x128xf32>
    %63 = arith.mulf %49, %62 : vector<8x8x128xf32>
    %cst_24 = arith.constant dense<0.000000e+00> : vector<128xf32>
    %64 = vector.multi_reduction <add>, %63, %cst_24 [0, 1] : vector<8x8x128xf32> to vector<128xf32>
    %65 = vector.shape_cast %64 : vector<128xf32> to vector<1x1x128xf32>
    %66 = tpu.iota {dimensions = array<i32: 2>} : vector<1x1x128xi32>
    %c16_i32 = arith.constant 16 : i32
    %67 = vector.broadcast %c16_i32 : i32 to vector<1x1x128xi32>
    %68 = arith.cmpi slt, %66, %67 : vector<1x1x128xi32>
    %69 = arith.extui %68 : vector<1x1x128xi1> to vector<1x1x128xi32>
    %70 = arith.sitofp %69 : vector<1x1x128xi32> to vector<1x1x128xf32>
    %71 = arith.mulf %65, %70 : vector<1x1x128xf32>
    %c0_25 = arith.constant 0 : index
    %c0_26 = arith.constant 0 : index
    %c0_27 = arith.constant 0 : index
    %72 = vector.load %arg3[%c0_25, %c0_26, %c0_27] : memref<1x1x128xf32, #tpu.memory_space<vmem>>, vector<1x1x128xf32>
    tpu.vector_store %arg3[%c0_25, %c0_26, %c0_27], %71 {strides = array<i32>} : memref<1x1x128xf32, #tpu.memory_space<vmem>>, vector<1x1x128xf32>,
    return
  }
  func.func @transform_0(%arg0: i32) -> (i32, i32, i32) {
    %c0_i32 = arith.constant 0 : i32
    %c0_i32_0 = arith.constant 0 : i32
    %c0_i32_1 = arith.constant 0 : i32
    return %c0_i32, %arg0, %c0_i32_0 : i32, i32, i32
  }
  func.func @transform_1(%arg0: i32) -> (i32, i32, i32) {
    %c0_i32 = arith.constant 0 : i32
    %c0_i32_0 = arith.constant 0 : i32
    %c0_i32_1 = arith.constant 0 : i32
    %c0_i32_2 = arith.constant 0 : i32
    return %c0_i32, %c0_i32_0, %c0_i32_1 : i32, i32, i32
  }
  func.func @transform_2(%arg0: i32) -> (i32, i32, i32) {
    %c0_i32 = arith.constant 0 : i32
    %c0_i32_0 = arith.constant 0 : i32
    %c0_i32_1 = arith.constant 0 : i32
    return %arg0, %c0_i32, %c0_i32_0 : i32, i32, i32
  }
}

</mosaic_0001>

<bundles_post_ra>
// kernel: tpu_custom_call.1
= control target key start
LH: loop header
LB: loop body
LE: loop exit
PB: predicated region body
PF: predicated region fallthrough
CT: control target
= control target key end

     0   :  { %7 = vsyncpa [#allocation3], 0  ;;  %s940_s0 = inlined_call_operand.hbm [shape: f32[3,8,128], index: 0, kind: input, shape index: {}]   ;;  %s941_s1 = inlined_call_operand.hbm [shape: f32[3,8,128], index: 1, kind: input, shape index: {}]   ;;  %s942_s2 = inlined_call_operand.hbm [shape: f32[1,1,128], index: 2, kind: output, shape index: {}]  }
   0x1   :  { %8 = vsyncpa [#allocation6], 0 }
   0x2   :  { %9 = vsyncpa [#allocation4], 0  ;;  %s730_s9 = smov [#allocation2]   ;;  %s658_s13 = scalar_lea.hbm %s940_s0, 384 }
   0x3   :  { %s15_s10 = sshll.u32 %s730_s9, 4  ;;  %p659_p0 = scmp.ne.s32.totalorder %s940_s0, %s658_s13  ;;  %s16_s10 = int_to_ptr.vmem [resolvable:$true] %s15_s10 }
   0x4   :  { %p662_p1 = scmp.lt.u32.totalorder %s658_s13, %s940_s0 }
   0x6   :  { %p664_p2 = pnand %p662_p1, %p659_p0 }
   0x8   :  { %667 = shalt.err (!%p664_p2)
}
   0x9   :  { %s668_s18 = scalar_lea.vmem %s16_s10, 384  ;;  %p673_p4 = scmp.lt.s32.totalorder %s16_s10, %s16_s10 }
   0xa   :  { %p669_p3 = scmp.ne.s32.totalorder %s16_s10, %s668_s18  ;;  %p674_p5 = scmp.lt.s32.totalorder %s668_s18, %s668_s18 }
   0xc   :  { %p675_p6 = por %p674_p5, %p673_p4 }
   0xe   :  { %p676_p7 = pnand %p675_p6, %p669_p3 }
  0x10   :  { %679 = shalt.err (!%p676_p7)
}
  0x11   :  { %s731_s19 = smov 128   ;;  %s732_s20 = smov 8  }
  0x12   :  { %21 = dma.hbm_to_vmem [thread:$0]  %s940_s0, 384, %s16_s10, [#allocation3], %s731_s19, %s731_s19, %s732_s20  }
  0x13   :  { %s733_s23 = smov [#allocation5]   ;;  %s680_s27 = scalar_lea.hbm %s941_s1, 384 }
  0x14   :  { %s27_s24 = sshll.u32 %s733_s23, 4  ;;  %p681_p8 = scmp.ne.s32.totalorder %s941_s1, %s680_s27  ;;  %s28_s24 = int_to_ptr.vmem [resolvable:$true] %s27_s24 }
  0x15   :  { %p684_p9 = scmp.lt.u32.totalorder %s680_s27, %s941_s1 }
  0x17   :  { %p686_p10 = pnand %p684_p9, %p681_p8 }
  0x19   :  { %689 = shalt.err (!%p686_p10)
}
  0x1a   :  { %s690_s4 = scalar_lea.vmem %s28_s24, 384  ;;  %p695_p12 = scmp.lt.s32.totalorder %s28_s24, %s28_s24 }
  0x1b   :  { %p691_p11 = scmp.ne.s32.totalorder %s28_s24, %s690_s4  ;;  %p696_p13 = scmp.lt.s32.totalorder %s690_s4, %s690_s4 }
  0x1d   :  { %p697_p0 = por %p696_p13, %p695_p12 }
  0x1f   :  { %p698_p1 = pnand %p697_p0, %p691_p11 }
  0x21   :  { %701 = shalt.err (!%p698_p1)
}
  0x22   :  { %33 = dma.hbm_to_vmem [thread:$0]  %s941_s1, 384, %s28_s24, [#allocation6], %s731_s19, %s731_s19, %s732_s20  }
  0x23   :  { %724 = dma.done.wait [#allocation3], 384  }
  0x24   :  { %725 = vsyncadd [#allocation3], 4294966912  ;;  %v47_v0 = vlaneseq }
  0x25   :  { %726 = dma.done.wait [#allocation6], 384  }
  0x26   :  { %727 = vsyncadd [#allocation6], 4294966912  ;;  %v734_v1 = vmov 1966171168   ;;  %v48_v3 = vshrl.u32 %v47_v0, 7  ;;  %v776_v4 = vand.u32 127, %v47_v0 }
  0x27   :  { %v45_v2 = vunpack.c.l.s4 %v734_v1  ;;  %v735_v12 = vmov 0.0   ;;  %v40_v19 = vld [vmem:[#allocation2] sm:$0xff]  ;;  %v786_v20 = vld [vmem:[#allocation2 + $0x8] sm:$0xff]  ;;  %v788_v25 = vld [vmem:[#allocation2 + $0x10] sm:$0xff]  ;;  %s736_s1 = smov [#allocation7]  }
  0x28   :  { %v778_v6 = vsub.s32 0, %v48_v3  ;;  %vm503_vm0 = vcmp.lt.s32.totalorder %v48_v3, %v776_v4  ;;  %vm504_vm1 = vcmp.lt.s32.totalorder %v776_v4, 4  ;;  %v524_v7 = vsub.s32 2, %v48_v3  ;;  %v800_v37 = vld [vmem:[#allocation5] sm:$0xff]  ;;  %v802_v38 = vld [vmem:[#allocation5 + $0x8] sm:$0xff]  ;;  %v804_v39 = vld [vmem:[#allocation5 + $0x10] sm:$0xff] }
  0x29   :  { %v46_v5 = vunpack.c.0.s8 %v45_v2  ;;  %vm505_vm2 = vmand %vm503_vm0, %vm504_vm1  ;;  %v517_v9 = vsub.s32 1, %v48_v3  ;;  %v531_v10 = vsub.s32 3, %v48_v3  ;;  %v538_v11 = vsub.s32 4, %v48_v3  ;;  %s596_s6 = sshll.u32 %s736_s1, 4  ;;  %s597_s6 = int_to_ptr.vmem [resolvable:$true] %s596_s6 }
  0x2a   :  { %v630_v13 = vsel %vm505_vm2, 1.0, %v735_v12  ;;  %v545_v14 = vsub.s32 5, %v48_v3  ;;  %v552_v15 = vsub.s32 6, %v48_v3  ;;  %v559_v16 = vsub.s32 7, %v48_v3  ;;  %s702_s7 = scalar_lea.vmem %s597_s6, 16  ;;  %s706_s8 = scalar_lea.vmem %s597_s6, 32 }
  0x2b   :  { %v782_v8 = vsub.s32 %v46_v5, %v48_v3  ;;  %v511_v17 = vrot.slane %v630_v13, %v778_v6  ;;  %v525_v18 = vrot.slane %v630_v13, %v524_v7  ;;  %v518_v21 = vrot.slane %v630_v13, %v517_v9  ;;  %p703_p2 = scmp.ne.s32.totalorder %s597_s6, %s702_s7  ;;  %p707_p3 = scmp.lt.s32.totalorder %s597_s6, %s597_s6 }
  0x2c   :  { %v532_v22 = vrot.slane %v630_v13, %v531_v10  ;;  %v539_v23 = vrot.slane %v630_v13, %v538_v11  ;;  %v546_v24 = vrot.slane %v630_v13, %v545_v14  ;;  %v553_v29 = vrot.slane %v630_v13, %v552_v15  ;;  %p708_p4 = scmp.lt.s32.totalorder %s706_s8, %s702_s7 }
  0x2d   :  { %513 = vbcast.lane.b32.xlu0 %v511_v17, 256  ;;  %527 = vbcast.lane.b32.xlu1 %v525_v18, 256  ;;  %v50_v26 = vrot.slane %v40_v19, %v782_v8  ;;  %v176_v27 = vrot.slane %v786_v20, %v782_v8  ;;  %v310_v28 = vrot.slane %v788_v25, %v782_v8  ;;  %vm585_vm3 = vcmp.lt.s32.totalorder %v776_v4, 16 }
  0x2e   :  { %v560_v30 = vrot.slane %v630_v13, %v559_v16  ;;  %v43_v31 = vcombine.high %v40_v19, %v40_v19  ;;  %v169_v32 = vcombine.high %v786_v20, %v786_v20  ;;  %v303_v43 = vcombine.high %v788_v25, %v788_v25  ;;  %p709_p5 = por %p708_p4, %p707_p3 }
  0x2f   :  { %v66_v33 = vrot.slane %v50_v26, %v782_v8  ;;  %v192_v34 = vrot.slane %v176_v27, %v782_v8  ;;  %v326_v35 = vrot.slane %v310_v28, %v782_v8  ;;  %v58_v36 = vcombine.high %v50_v26, %v50_v26 }
  0x30   :  { %v184_v40 = vcombine.high %v176_v27, %v176_v27  ;;  %v318_v41 = vcombine.high %v310_v28, %v310_v28  ;;  %v807_v42 = vrot.slane %v43_v31, %v782_v8  ;;  %v317_v20 = vrot.slane %v303_v43, %v782_v8  ;;  %p710_p6 = pnand %p709_p5, %p703_p2 }
  0x31   :  { %520 = vbcast.lane.b32.xlu0 %v518_v21, 256  ;;  %534 = vbcast.lane.b32.xlu1 %v532_v22, 256  ;;  %v95_v44 = vrot.slane %v66_v33, %v778_v6  ;;  %v221_v45 = vrot.slane %v192_v34, %v778_v6  ;;  %v355_v46 = vrot.slane %v326_v35, %v778_v6 }
  0x32   :  { %v88_v47 = vcombine.high %v66_v33, %v66_v33  ;;  %v214_v48 = vcombine.high %v192_v34, %v192_v34  ;;  %v348_v49 = vcombine.high %v326_v35, %v326_v35  ;;  %v80_v50 = vrot.slane %v58_v36, %v782_v8 }
  0x33   :  { %v132_v51 = vsub.f32 %v95_v44, %v800_v37  ;;  %v258_v52 = vsub.f32 %v221_v45, %v802_v38  ;;  %v392_v53 = vsub.f32 %v355_v46, %v804_v39  ;;  %v206_v54 = vrot.slane %v184_v40, %v782_v8 }
  0x34   :  { %v103_v55 = vrot.slane %v88_v47, %v778_v6  ;;  %v229_v56 = vrot.slane %v214_v48, %v778_v6  ;;  %v363_v57 = vrot.slane %v348_v49, %v778_v6  ;;  %v99_v58 = vrot.slane %v80_v50, %v778_v6 }
  0x35   :  { %541 = vbcast.lane.b32.xlu0 %v539_v23, 256  ;;  %548 = vbcast.lane.b32.xlu1 %v546_v24, 256  ;;  %v606_v59 = vclamps-f32 %v132_v51, 1000000.0  ;;  %v614_v60 = vclamps-f32 %v258_v52, 1000000.0  ;;  %v225_v61 = vrot.slane %v206_v54, %v778_v6  ;;  %v340_v62 = vrot.slane %v318_v41, %v782_v8 }
  0x36   :  { %v622_v63 = vclamps-f32 %v392_v53, 1000000.0  ;;  %v134_v0 = vsub.f32 %v103_v55, %v800_v37  ;;  %v260_v1 = vsub.f32 %v229_v56, %v802_v38  ;;  %v394_v2 = vsub.f32 %v363_v57, %v804_v39 }
  0x37   :  { %v156_v3 = vmul.f32 %v606_v59, %v606_v59  ;;  %v282_v5 = vmul.f32 %v614_v60, %v614_v60  ;;  %v133_v7 = vsub.f32 %v99_v58, %v800_v37  ;;  %v259_v9 = vsub.f32 %v225_v61, %v802_v38 }
  0x38   :  { %v416_v10 = vmul.f32 %v622_v63, %v622_v63  ;;  %v608_v11 = vclamps-f32 %v134_v0, 1000000.0  ;;  %v616_v13 = vclamps-f32 %v260_v1, 1000000.0  ;;  %v624_v14 = vclamps-f32 %v394_v2, 1000000.0 }
  0x39   :  { %555 = vbcast.lane.b32.xlu0 %v553_v29, 256  ;;  %562 = vbcast.lane.b32.xlu1 %v560_v30, 256  ;;  %v290_v15 = vadd.f32 %v282_v5, %v156_v3  ;;  %v607_v16 = vclamps-f32 %v133_v7, 1000000.0  ;;  %v615_v17 = vclamps-f32 %v259_v9, 1000000.0  ;;  %v359_v18 = vrot.slane %v340_v62, %v778_v6 }
  0x3a   :  { %v158_v19 = vmul.f32 %v608_v11, %v608_v11  ;;  %v284_v21 = vmul.f32 %v616_v13, %v616_v13  ;;  %v418_v22 = vmul.f32 %v624_v14, %v624_v14  ;;  %v90_v23 = vcombine.high %v80_v50, %v80_v50 }
  0x3b   :  { %v831_v24 = vadd.f32 %v416_v10, %v290_v15  ;;  %v157_v26 = vmul.f32 %v607_v16, %v607_v16  ;;  %v283_v27 = vmul.f32 %v615_v17, %v615_v17  ;;  %v393_v28 = vsub.f32 %v359_v18, %v804_v39 }
  0x3c   :  { %v292_v31 = vadd.f32 %v284_v21, %v158_v19  ;;  %v107_v33 = vrot.slane %v90_v23, %v778_v6  ;;  %v216_v29 = vcombine.high %v206_v54, %v206_v54  ;;  %v350_v30 = vcombine.high %v340_v62, %v340_v62 }
  0x3d   :  { %v291_v34 = vadd.f32 %v283_v27, %v157_v26  ;;  %v623_v35 = vclamps-f32 %v393_v28, 1000000.0  ;;  %v73_v36 = vrot.slane %v807_v42, %v782_v8  ;;  %v183_v40 = vrot.slane %v169_v32, %v782_v8 }
  0x3e   :  { %v841_v41 = vadd.f32 %v418_v22, %v292_v31  ;;  %v135_v44 = vsub.f32 %v107_v33, %v800_v37  ;;  %v233_v45 = vrot.slane %v216_v29, %v778_v6  ;;  %v367_v46 = vrot.slane %v350_v30, %v778_v6 }
  0x3f   :  { %v417_v47 = vmul.f32 %v623_v35, %v623_v35  ;;  %v111_v51 = vrot.slane %v73_v36, %v778_v6  ;;  %v199_v52 = vrot.slane %v183_v40, %v782_v8  ;;  %v333_v58 = vrot.slane %v317_v20, %v782_v8 }
  0x40   :  { %v609_v48 = vclamps-f32 %v135_v44, 1000000.0  ;;  %v261_v49 = vsub.f32 %v233_v45, %v802_v38  ;;  %v395_v50 = vsub.f32 %v367_v46, %v804_v39  ;;  %v59_v59 = vcombine.high %v807_v42, %v807_v42 }
  0x41   :  { %v854_v32 = vadd.f32 %v417_v47, %v291_v34  ;;  %v136_v56 = vsub.f32 %v111_v51, %v800_v37  ;;  %v237_v57 = vrot.slane %v199_v52, %v778_v6  ;;  %v185_v62 = vcombine.high %v183_v40, %v183_v40 }
  0x42   :  { %v159_v53 = vmul.f32 %v609_v48, %v609_v48  ;;  %v617_v54 = vclamps-f32 %v261_v49, 1000000.0  ;;  %v625_v55 = vclamps-f32 %v395_v50, 1000000.0  ;;  %v371_v43 = vrot.slane %v333_v58, %v778_v6 }
  0x43   :  { %v610_v63 = vclamps-f32 %v136_v56, 1000000.0  ;;  %v262_v25 = vsub.f32 %v237_v57, %v802_v38  ;;  %v87_v0 = vrot.slane %v59_v59, %v782_v8  ;;  %v213_v9 = vrot.slane %v185_v62, %v782_v8 }
  0x44   :  { %v285_v60 = vmul.f32 %v617_v54, %v617_v54  ;;  %v419_v61 = vmul.f32 %v625_v55, %v625_v55  ;;  %v396_v5 = vsub.f32 %v371_v43, %v804_v39  ;;  %v319_v42 = vcombine.high %v317_v20, %v317_v20 }
  0x45   :  { %v160_v2 = vmul.f32 %v610_v63, %v610_v63  ;;  %v618_v3 = vclamps-f32 %v262_v25, 1000000.0  ;;  %v115_v7 = vrot.slane %v87_v0, %v778_v6  ;;  %v89_v10 = vcombine.high %v73_v36, %v73_v36 }
  0x46   :  { %v293_v1 = vadd.f32 %v285_v60, %v159_v53  ;;  %v626_v14 = vclamps-f32 %v396_v5, 1000000.0  ;;  %v241_v16 = vrot.slane %v213_v9, %v778_v6  ;;  %v347_v21 = vrot.slane %v319_v42, %v782_v8 }
  0x47   :  { %v286_v13 = vmul.f32 %v618_v3, %v618_v3  ;;  %v137_v15 = vsub.f32 %v115_v7, %v800_v37  ;;  %v119_v17 = vrot.slane %v89_v10, %v778_v6  ;;  %v215_v29 = vcombine.high %v199_v52, %v199_v52 }
  0x48   :  { %v427_v11 = vadd.f32 %v419_v61, %v293_v1  ;;  %v420_v19 = vmul.f32 %v626_v14, %v626_v14  ;;  %v263_v23 = vsub.f32 %v241_v16, %v802_v38  ;;  %v375_v31 = vrot.slane %v347_v21, %v778_v6 }
  0x49   :  { %v294_v18 = vadd.f32 %v286_v13, %v160_v2  ;;  %v611_v22 = vclamps-f32 %v137_v15, 1000000.0  ;;  %v138_v33 = vsub.f32 %v119_v17, %v800_v37  ;;  %v349_v34 = vcombine.high %v333_v58, %v333_v58 }
  0x4a   :  { %v619_v27 = vclamps-f32 %v263_v23, 1000000.0  ;;  %v91_v35 = vcombine.high %v87_v0, %v87_v0  ;;  %v397_v36 = vsub.f32 %v375_v31, %v804_v39  ;;  %v245_v44 = vrot.slane %v215_v29, %v778_v6 }
  0x4b   :  { %v428_v26 = vadd.f32 %v420_v19, %v294_v18  ;;  %v161_v28 = vmul.f32 %v611_v22, %v611_v22  ;;  %v612_v40 = vclamps-f32 %v138_v33, 1000000.0  ;;  %v379_v48 = vrot.slane %v349_v34, %v778_v6 }
  0x4c   :  { %v287_v30 = vmul.f32 %v619_v27, %v619_v27  ;;  %v627_v45 = vclamps-f32 %v397_v36, 1000000.0  ;;  %v264_v47 = vsub.f32 %v245_v44, %v802_v38  ;;  %v123_v49 = vrot.slane %v91_v35, %v778_v6 }
  0x4d   :  { %v162_v46 = vmul.f32 %v612_v40, %v612_v40  ;;  %v217_v51 = vcombine.high %v213_v9, %v213_v9  ;;  %v351_v52 = vcombine.high %v347_v21, %v347_v21  ;;  %v398_v53 = vsub.f32 %v379_v48, %v804_v39 }
  0x4e   :  { %v295_v8 = vadd.f32 %v287_v30, %v161_v28  ;;  %v421_v50 = vmul.f32 %v627_v45, %v627_v45  ;;  %v620_v20 = vclamps-f32 %v264_v47, 1000000.0  ;;  %v139_v54 = vsub.f32 %v123_v49, %v800_v37 }
  0x4f   :  { %v883_v55 = vsel %vm585_vm3, 1.0, %v735_v12  ;;  %v249_v57 = vrot.slane %v217_v51, %v778_v6  ;;  %v383_v58 = vrot.slane %v351_v52, %v778_v6  ;;  %v628_v60 = vclamps-f32 %v398_v53, 1000000.0 }
  0x50   :  { %v429_v56 = vadd.f32 %v421_v50, %v295_v8  ;;  %v288_v59 = vmul.f32 %v620_v20, %v620_v20  ;;  %v613_v61 = vclamps-f32 %v139_v54, 1000000.0  ;;  %v432_v7 = vadd.f32 1e-06, %v831_v24 }
  0x51   :  { %v265_v62 = vsub.f32 %v249_v57, %v802_v38  ;;  %v399_v4 = vsub.f32 %v383_v58, %v804_v39  ;;  %v422_v25 = vmul.f32 %v628_v60, %v628_v60  ;;  %v433_v6 = vadd.f32 1e-06, %v854_v32 }
  0x52   :  { %v296_v63 = vadd.f32 %v288_v59, %v162_v46  ;;  %v163_v1 = vmul.f32 %v613_v61, %v613_v61  ;;  %v434_v9 = vadd.f32 1e-06, %v841_v41  ;;  %v435_v42 = vadd.f32 1e-06, %v427_v11 }
  0x53   :  { %v621_v0 = vclamps-f32 %v265_v62, 1000000.0  ;;  %v629_v37 = vclamps-f32 %v399_v4, 1000000.0  ;;  %642 = vrsqrt.f32 %v432_v7  ;;  %v892_v38 = vadd.f32 1e-06, %v428_v26 }
  0x54   :  { %v430_v43 = vadd.f32 %v422_v25, %v296_v63  ;;  %644 = vrsqrt.f32 %v433_v6  ;;  %v894_v39 = vadd.f32 1e-06, %v429_v56  ;;  %vm442_vm4 = vcmp.eq.f32.partialorder %v432_v7, inf }
  0x55   :  { %v289_v12 = vmul.f32 %v621_v0, %v621_v0  ;;  %v423_v2 = vmul.f32 %v629_v37, %v629_v37  ;;  %646 = vrsqrt.f32 %v434_v9  ;;  %vm449_vm5 = vcmp.eq.f32.partialorder %v433_v6, inf }
  0x56   :  { %648 = vrsqrt.f32 %v435_v42  ;;  %v897_v10 = vadd.f32 1e-06, %v430_v43  ;;  %vm444_vm6 = vcmp.eq.f32.partialorder %v432_v7, 0.0  ;;  %vm456_vm7 = vcmp.eq.f32.partialorder %v434_v9, inf }
  0x57   :  { %v297_v3 = vadd.f32 %v289_v12, %v163_v1  ;;  %650 = vrsqrt.f32 %v892_v38  ;;  %v445_v21 = vand.u32 2147483648, %v432_v7  ;;  %v459_v22 = vand.u32 2147483648, %v434_v9 }
  0x58   :  { %652 = vrsqrt.f32 %v894_v39  ;;  %v452_v23 = vand.u32 2147483648, %v433_v6  ;;  %vm463_vm8 = vcmp.eq.f32.partialorder %v435_v42, inf  ;;  %vm451_vm9 = vcmp.eq.f32.partialorder %v433_v6, 0.0 }
  0x59   :  { %v431_v5 = vadd.f32 %v423_v2, %v297_v3  ;;  %654 = vrsqrt.f32 %v897_v10  ;;  %vm458_vm10 = vcmp.eq.f32.partialorder %v434_v9, 0.0  ;;  %v466_v34 = vand.u32 2147483648, %v435_v42 }
  0x5a   :  { %vm470_vm11 = vcmp.eq.f32.partialorder %v892_v38, inf  ;;  %vm465_vm12 = vcmp.eq.f32.partialorder %v435_v42, 0.0  ;;  %v473_v45 = vand.u32 2147483648, %v892_v38  ;;  %vm477_vm13 = vcmp.eq.f32.partialorder %v894_v39, inf }
  0x5b   :  { %v900_v24 = vadd.f32 1e-06, %v431_v5  ;;  %vm472_vm14 = vcmp.eq.f32.partialorder %v892_v38, 0.0  ;;  %vm479_vm15 = vcmp.eq.f32.partialorder %v894_v39, 0.0  ;;  %v480_v52 = vand.u32 2147483648, %v894_v39 }
  0x5c   :  { %vm484_vm0 = vcmp.eq.f32.partialorder %v897_v10, inf  ;;  %vm486_vm1 = vcmp.eq.f32.partialorder %v897_v10, 0.0  ;;  %v487_v58 = vand.u32 2147483648, %v897_v10 }
  0x5d   :  { %v643_v41 = vpop.eup %642  ;;  %656 = vrsqrt.f32 %v900_v24  ;;  %vm491_vm2 = vcmp.eq.f32.partialorder %v900_v24, inf  ;;  %v494_v43 = vand.u32 2147483648, %v900_v24  ;;  %vm493_vm3 = vcmp.eq.f32.partialorder %v900_v24, 0.0 }
  0x5e   :  { %v645_v32 = vpop.eup %644  ;;  %v441_v14 = vmul.f32 %v643_v41, %v432_v7 }
  0x5f   :  { %v647_v11 = vpop.eup %646  ;;  %v448_v15 = vmul.f32 %v645_v32, %v433_v6 }
  0x60   :  { %v649_v13 = vpop.eup %648  ;;  %v455_v17 = vmul.f32 %v647_v11, %v434_v9  ;;  %v443_v26 = vsel %vm442_vm4, %v432_v7, %v441_v14 }
  0x61   :  { %v651_v16 = vpop.eup %650  ;;  %v462_v18 = vmul.f32 %v649_v13, %v435_v42  ;;  %v450_v27 = vsel %vm449_vm5, %v433_v6, %v448_v15  ;;  %v446_v44 = vsel %vm444_vm6, %v445_v21, %v443_v26 }
  0x62   :  { %v653_v19 = vpop.eup %652  ;;  %v469_v28 = vmul.f32 %v651_v16, %v892_v38  ;;  %v457_v30 = vsel %vm456_vm7, %v434_v9, %v455_v17  ;;  %v453_v8 = vsel %vm451_vm9, %v452_v23, %v450_v27 }
  0x63   :  { %v655_v31 = vpop.eup %654  ;;  %v464_v35 = vsel %vm463_vm8, %v435_v42, %v462_v18  ;;  %v476_v36 = vmul.f32 %v653_v19, %v894_v39  ;;  %v460_v46 = vsel %vm458_vm10, %v459_v22, %v457_v30 }
  0x64   :  { %v471_v47 = vsel %vm470_vm11, %v892_v38, %v469_v28  ;;  %v483_v48 = vmul.f32 %v655_v31, %v897_v10  ;;  %v467_v51 = vsel %vm465_vm12, %v466_v34, %v464_v35 }
  0x65   :  { %v478_v54 = vsel %vm477_vm13, %v894_v39, %v476_v36  ;;  %v474_v57 = vsel %vm472_vm14, %v473_v45, %v471_v47 }
  0x66   :  { %v485_v62 = vsel %vm484_vm0, %v897_v10, %v483_v48  ;;  %v481_v25 = vsel %vm479_vm15, %v480_v52, %v478_v54 }
  0x67   :  { %v657_v40 = vpop.eup %656  ;;  %v488_v12 = vsel %vm486_vm1, %v487_v58, %v485_v62 }
  0x68   :  { %v490_v56 = vmul.f32 %v657_v40, %v900_v24 }
  0x6a   :  { %v492_v1 = vsel %vm491_vm2, %v900_v24, %v490_v56 }
  0x6b   :  { %v495_v6 = vsel %vm493_vm3, %v494_v43, %v492_v1 }
  0x9f   :  { %v514_v33 = vpop.permute.xlu0 %513  ;;  %v528_v29 = vpop.permute.xlu1 %527 }
  0xa0   :  { %v564_v20 = vmul.f32 %v514_v33, %v446_v44  ;;  %v566_v59 = vmul.f32 %v528_v29, %v460_v46 }
  0xa3   :  { %v521_v49 = vpop.permute.xlu0 %520  ;;  %v535_v50 = vpop.permute.xlu1 %534 }
  0xa4   :  { %v565_v53 = vmul.f32 %v521_v49, %v453_v8  ;;  %v567_v61 = vmul.f32 %v535_v50, %v467_v51 }
  0xa6   :  { %v572_v60 = vadd.f32 %v565_v53, %v564_v20 }
  0xa7   :  { %v542_v4 = vpop.permute.xlu0 %541  ;;  %v549_v63 = vpop.permute.xlu1 %548 }
  0xa8   :  { %v573_v0 = vadd.f32 %v572_v60, %v566_v59  ;;  %v568_v37 = vmul.f32 %v542_v4, %v474_v57  ;;  %v569_v3 = vmul.f32 %v549_v63, %v481_v25 }
  0xaa   :  { %v574_v2 = vadd.f32 %v573_v0, %v567_v61 }
  0xab   :  { %v556_v5 = vpop.permute.xlu0 %555  ;;  %v563_v7 = vpop.permute.xlu1 %562 }
  0xac   :  { %v575_v9 = vadd.f32 %v574_v2, %v568_v37  ;;  %v570_v42 = vmul.f32 %v556_v5, %v488_v12  ;;  %v571_v10 = vmul.f32 %v563_v7, %v495_v6 }
  0xae   :  { %v576_v38 = vadd.f32 %v575_v9, %v569_v3 }
  0xb0   :  { %v577_v39 = vadd.f32 %v576_v38, %v570_v42 }
  0xb2   :  { %v578_v41 = vadd.f32 %v577_v39, %v571_v10 }
  0xb4   :  { %v579_v32 = vrot.slane %v578_v41, 4 }
  0xb6   :  { %v580_v11 = vadd.f32 %v579_v32, %v578_v41 }
  0xb8   :  { %v581_v13 = vrot.slane %v580_v11, 2 }
  0xba   :  { %v582_v14 = vadd.f32 %v581_v13, %v580_v11 }
  0xbc   :  { %v583_v15 = vrot.slane %v582_v14, 1 }
  0xbe   :  { %v584_v24 = vadd.f32 %v583_v15, %v582_v14 }
  0xc0   :  { %v588_v16 = vmul.f32 %v883_v55, %v584_v24 }
  0xc2   :  { %589 = vst [vmem:[#allocation7] sm:$0x1] %v588_v16 }
  0xc3   :  { %713 = shalt.err (!%p710_p6)
}
  0xc4   :  { %s714_s11 = scalar_lea.hbm %s942_s2, 16 }
  0xc5   :  { %p715_p7 = scmp.ne.s32.totalorder %s942_s2, %s714_s11  ;;  %p718_p8 = scmp.lt.u32.totalorder %s714_s11, %s942_s2 }
  0xc7   :  { %p720_p9 = pnand %p718_p8, %p715_p7 }
  0xc9   :  { %723 = shalt.err (!%p720_p9)
}
  0xca   :  { %599 = dma.vmem_to_hbm [thread:$0]  %s597_s6, 16, %s942_s2, [#allocation4]  }
  0xcb   :  { %728 = dma.done.wait [#allocation4], 16  }
  0xcc   :  { %729 = vsyncadd [#allocation4], 4294967280 }
  0xcd   :  { %603 = vsyncpa [#allocation3], 1 }
  0xce   :  { %604 = vsyncpa [#allocation6], 1 }
  0xcf   :  { %605 = vsyncpa [#allocation4], 1 }

</bundles_post_ra>
